<compile_context>
chip_gen: v6e
topology: v6e:2x2x1
jax: 0.10.0
libtpu: 0.0.40
codegen_flags: <defaults>
</compile_context>

<pallas_src>
import functools
from itertools import combinations

import numpy as np

import jax
import jax.numpy as jnp
from jax import lax
from jax.experimental import pallas as pl
from jax.experimental.pallas import tpu as pltpu

EPS = 1e-12  # F.normalize default eps


def _l2_normalize(v):
    # F.normalize: v / max(||v||, eps)  ==  v * rsqrt(max(||v||^2, eps^2))
    ss = jnp.sum(v * v, axis=1, keepdims=True)
    return v * lax.rsqrt(jnp.maximum(ss, EPS * EPS))


def distloss_kernel(x_ref, cents_ref, wp_ref, bp_ref, dist_ref, assign_ref,
                    *, num_base, num_pairs):
    K, C = num_base, num_pairs

    x = x_ref[...]                         # (N, D)
    packed = cents_ref[...]                # (K + 2C, D)
    W = packed[:K, :]                      # (K, D)
    a = packed[K:K + C, :]                 # (C, D)  = W[pairs[:,0]]
    b = packed[K + C:K + 2 * C, :]         # (C, D)  = W[pairs[:,1]]
    wp = wp_ref[...]                       # (2D, D) = [w1a ; w1b]
    bp = bp_ref[...]                       # (2, D)  = [b1a ; b1b]

    # G_net folded into a single MXU matmul with contraction depth 2D.
    gin = jnp.concatenate([a + b, a * b], axis=1)                       # (C, 2D)
    bias = 2.0 * bp[0:1, :] + bp[1:2, :]                                # (1, D)
    merged = jnp.dot(gin, wp, preferred_element_type=jnp.float32) + bias  # (C, D)

    cents = jnp.concatenate([W, merged], axis=0)                        # (M, D)
    xn = _l2_normalize(x)                                               # (N, D)
    cn = _l2_normalize(cents)                                           # (M, D)

    N = x.shape[0]
    M = cents.shape[0]

    # Transposed dot products: (M, N) = cn @ xn^T  (single MXU op).
    dT = lax.dot_general(cn, xn, (((1,), (1,)), ((), ())),
                         preferred_element_type=jnp.float32)            # (M, N)

    # argmin of distance == argmax of dot; first occurrence on ties (along M).
    dmax = jnp.max(dT, axis=0, keepdims=True)                           # (1, N)
    row = lax.broadcasted_iota(jnp.int32, (M, N), 0)
    idx = jnp.min(jnp.where(dT >= dmax, row, M), axis=0, keepdims=True)  # (1, N)
    assign_ref[...] = idx

    # Per-row minimum squared distance between unit-norm rows; clamp guards tiny
    # negative values from rounding when a point is (nearly) collinear with a centroid.
    dmin = jnp.maximum(2.0 - 2.0 * dmax, 0.0)                           # (1, N)
    # torch.dist(p=2) == Frobenius norm of (cn[assign] - xn) == sqrt(sum_i dmin_i)
    dist_ref[...] = jnp.sqrt(jnp.sum(dmin, axis=1, keepdims=True))      # (1, 1)


def dist_loss_forward(x, W, w1a, b1a, w1b, b1b):
    K = W.shape[0]
    pairs = np.asarray(list(combinations(range(K), 2)), dtype=np.int32)  # (C, 2)
    C = pairs.shape[0]
    comb_a = W[pairs[:, 0]]   # static-index gather (glue; matches self.W[comb.T[0]])
    comb_b = W[pairs[:, 1]]
    N = x.shape[0]

    # Pack 8 small inputs into 3 (fewer DMA descriptors on a launch-overhead-bound kernel).
    cents_in = jnp.concatenate([W, comb_a, comb_b], axis=0)   # (K + 2C, D)
    w_packed = jnp.concatenate([w1a, w1b], axis=0)            # (2D, D)
    b_packed = jnp.concatenate([b1a, b1b], axis=0)            # (2, D)

    vmem = pl.BlockSpec(memory_space=pltpu.MemorySpace.VMEM)
    kernel = functools.partial(distloss_kernel, num_base=K, num_pairs=C)

    # Single loss instance -> ungridded call (runs on one TensorCore). If many
    # instances are evaluated per step, add a leading 'parallel' grid axis over
    # instances to use both TCs on v7x.
    dist, assign = pl.pallas_call(
        kernel,
        out_shape=(jax.ShapeDtypeStruct((1, 1), jnp.float32),
                   jax.ShapeDtypeStruct((1, N), jnp.int32)),
        in_specs=[vmem] * 4,
        out_specs=(vmem, vmem),
    )(x, cents_in, w_packed, b_packed)
    # note: PyTorch argmin returns int64; we return int32 indices.
    return dist[0, 0], assign[0, :]


def dist_loss_reference(x, W, w1a, b1a, w1b, b1b):
    """Pure-JAX reference mirroring the PyTorch forward."""
    K = W.shape[0]
    pairs = np.asarray(list(combinations(range(K), 2)), dtype=np.int32)
    a = W[pairs[:, 0]]
    b = W[pairs[:, 1]]
    merged = (a @ w1a + b1a) + (b @ w1a + b1a) + ((a * b) @ w1b + b1b)
    cents = jnp.concatenate([W, merged], axis=0)

    def nrm(v):
        n = jnp.linalg.norm(v, axis=1, keepdims=True)
        return v / jnp.maximum(n, EPS)

    xn = nrm(x)
    cn = nrm(cents)
    d = jnp.sqrt(jnp.sum((xn[:, None, :] - cn[None, :, :]) ** 2, axis=-1))
    assign = jnp.argmin(d, axis=1)
    diff = cn[assign] - xn
    return jnp.sqrt(jnp.sum(diff * diff)), assign


if __name__ == "__main__":
    N, D, K = 16, 32, 8   # 8 centroids of dim 32 -> 28 pairs -> 36 centroids total

    key = jax.random.PRNGKey(0)
    kx, kw, k1, k2, k3, k4 = jax.random.split(key, 6)
    x   = jax.random.normal(kx, (N, D), jnp.float32)
    W   = jax.random.normal(kw, (K, D), jnp.float32)            # self.W (init)
    w1a = jax.random.normal(k1, (D, D), jnp.float32) * 0.1      # linear1a weight^T
    b1a = jax.random.normal(k2, (1, D), jnp.float32) * 0.1      # linear1a bias
    w1b = jax.random.normal(k3, (D, D), jnp.float32) * 0.1      # linear1b weight^T
    b1b = jax.random.normal(k4, (1, D), jnp.float32) * 0.1      # linear1b bias

    dist, assign = dist_loss_forward(x, W, w1a, b1a, w1b, b1b)
    jax.block_until_ready((dist, assign))

    dist_ref, assign_ref = dist_loss_reference(x, W, w1a, b1a, w1b, b1b)
    assert np.array_equal(np.asarray(assign), np.asarray(assign_ref).astype(np.int32)), \
        "assignment mismatch"
    assert np.allclose(np.asarray(dist), np.asarray(dist_ref), rtol=1e-4, atol=1e-4), \
        "distance mismatch"

    print("KERNEL_OK")
</pallas_src>

<mosaic_0001>
module attributes {stable_mosaic.version = 11 : i64} {
  func.func @distloss_kernel(%arg0: memref<16x32xf32, #tpu.memory_space<vmem>>, %arg1: memref<64x32xf32, #tpu.memory_space<vmem>>, %arg2: memref<64x32xf32, #tpu.memory_space<vmem>>, %arg3: memref<2x32xf32, #tpu.memory_space<vmem>>, %arg4: memref<1x1xf32, #tpu.memory_space<vmem>>, %arg5: memref<1x16xi32, #tpu.memory_space<vmem>>) attributes {dimension_semantics = [], scalar_prefetch = 0 : i64, scratch_operands = 0 : i64, tpu.core_type = #tpu.core_type<tc>} {
    %c0 = arith.constant 0 : index
    %c0_0 = arith.constant 0 : index
    %0 = vector.load %arg0[%c0, %c0_0] : memref<16x32xf32, #tpu.memory_space<vmem>>, vector<16x32xf32>
    %c0_1 = arith.constant 0 : index
    %c0_2 = arith.constant 0 : index
    %1 = vector.load %arg1[%c0_1, %c0_2] : memref<64x32xf32, #tpu.memory_space<vmem>>, vector<64x32xf32>
    %2 = vector.extract_strided_slice %1 {offsets = [0, 0], sizes = [8, 32], strides = [1, 1]} : vector<64x32xf32> to vector<8x32xf32>
    %3 = vector.extract_strided_slice %1 {offsets = [8, 0], sizes = [28, 32], strides = [1, 1]} : vector<64x32xf32> to vector<28x32xf32>
    %4 = vector.extract_strided_slice %1 {offsets = [36, 0], sizes = [28, 32], strides = [1, 1]} : vector<64x32xf32> to vector<28x32xf32>
    %c0_3 = arith.constant 0 : index
    %c0_4 = arith.constant 0 : index
    %5 = vector.load %arg2[%c0_3, %c0_4] : memref<64x32xf32, #tpu.memory_space<vmem>>, vector<64x32xf32>
    %c0_5 = arith.constant 0 : index
    %c0_6 = arith.constant 0 : index
    %6 = vector.load %arg3[%c0_5, %c0_6] : memref<2x32xf32, #tpu.memory_space<vmem>>, vector<2x32xf32>
    %7 = arith.addf %3, %4 : vector<28x32xf32>
    %8 = arith.mulf %3, %4 : vector<28x32xf32>
    %9 = tpu.concatenate %7, %8 in 1 : vector<28x32xf32>, vector<28x32xf32> -> vector<28x64xf32>
    %10 = vector.extract_strided_slice %6 {offsets = [0, 0], sizes = [1, 32], strides = [1, 1]} : vector<2x32xf32> to vector<1x32xf32>
    %cst = arith.constant 2.000000e+00 : f32
    %11 = vector.broadcast %cst : f32 to vector<1x32xf32>
    %12 = arith.mulf %11, %10 : vector<1x32xf32>
    %13 = vector.extract_strided_slice %6 {offsets = [1, 0], sizes = [1, 32], strides = [1, 1]} : vector<2x32xf32> to vector<1x32xf32>
    %14 = arith.addf %12, %13 : vector<1x32xf32>
    %cst_7 = arith.constant dense<0.000000e+00> : vector<28x32xf32>
    %15 = tpu.matmul %9, %5, %cst_7 {dimension_numbers = #tpu.dot_dimension_numbers<[1], [0], [0], [1], [0, 0, 1, 1], [], []>} : vector<28x64xf32>, vector<64x32xf32>, vector<28x32xf32> -> vector<28x32xf32>
    %16 = vector.broadcast %14 : vector<1x32xf32> to vector<28x32xf32>
    %17 = arith.addf %15, %16 : vector<28x32xf32>
    %18 = tpu.concatenate %2, %17 in 0 : vector<8x32xf32>, vector<28x32xf32> -> vector<36x32xf32>
    %19 = arith.mulf %0, %0 : vector<16x32xf32>
    %cst_8 = arith.constant dense<0.000000e+00> : vector<16xf32>
    %20 = vector.multi_reduction <add>, %19, %cst_8 [1] : vector<16x32xf32> to vector<16xf32>
    %21 = vector.shape_cast %20 : vector<16xf32> to vector<16x1xf32>
    %cst_9 = arith.constant 1.000000e-24 : f32
    %22 = vector.broadcast %cst_9 : f32 to vector<16x1xf32>
    %23 = arith.maximumf %21, %22 : vector<16x1xf32>
    %24 = math.rsqrt %23 : vector<16x1xf32>
    %25 = vector.broadcast %24 : vector<16x1xf32> to vector<16x32xf32>
    %26 = arith.mulf %0, %25 : vector<16x32xf32>
    %27 = arith.mulf %18, %18 : vector<36x32xf32>
    %cst_10 = arith.constant dense<0.000000e+00> : vector<36xf32>
    %28 = vector.multi_reduction <add>, %27, %cst_10 [1] : vector<36x32xf32> to vector<36xf32>
    %29 = vector.shape_cast %28 : vector<36xf32> to vector<36x1xf32>
    %cst_11 = arith.constant 1.000000e-24 : f32
    %30 = vector.broadcast %cst_11 : f32 to vector<36x1xf32>
    %31 = arith.maximumf %29, %30 : vector<36x1xf32>
    %32 = math.rsqrt %31 : vector<36x1xf32>
    %33 = vector.broadcast %32 : vector<36x1xf32> to vector<36x32xf32>
    %34 = arith.mulf %18, %33 : vector<36x32xf32>
    %cst_12 = arith.constant dense<0.000000e+00> : vector<36x16xf32>
    %35 = tpu.matmul %34, %26, %cst_12 {dimension_numbers = #tpu.dot_dimension_numbers<[1], [1], [0], [0], [0, 0, 1, 0], [], []>} : vector<36x32xf32>, vector<16x32xf32>, vector<36x16xf32> -> vector<36x16xf32>
    %cst_13 = arith.constant dense<0xFF800000> : vector<16xf32>
    %36 = vector.multi_reduction <maximumf>, %35, %cst_13 [0] : vector<36x16xf32> to vector<16xf32>
    %37 = vector.shape_cast %36 : vector<16xf32> to vector<1x16xf32>
    %38 = tpu.iota {dimensions = array<i32: 0>} : vector<36x16xi32>
    %39 = vector.broadcast %37 : vector<1x16xf32> to vector<36x16xf32>
    %40 = arith.cmpf oge, %35, %39 : vector<36x16xf32>
    %c36_i32 = arith.constant 36 : i32
    %41 = vector.broadcast %c36_i32 : i32 to vector<36x16xi32>
    %42 = arith.select %40, %38, %41 : vector<36x16xi1>, vector<36x16xi32>
    %cst_14 = arith.constant dense<2147483647> : vector<16xi32>
    %43 = vector.multi_reduction <minsi>, %42, %cst_14 [0] : vector<36x16xi32> to vector<16xi32>
    %44 = vector.shape_cast %43 : vector<16xi32> to vector<1x16xi32>
    %c0_15 = arith.constant 0 : index
    %c0_16 = arith.constant 0 : index
    %45 = vector.load %arg5[%c0_15, %c0_16] : memref<1x16xi32, #tpu.memory_space<vmem>>, vector<1x16xi32>
    tpu.vector_store %arg5[%c0_15, %c0_16], %44 {strides = array<i32>} : memref<1x16xi32, #tpu.memory_space<vmem>>, vector<1x16xi32>,
    %cst_17 = arith.constant 2.000000e+00 : f32
    %46 = vector.broadcast %cst_17 : f32 to vector<1x16xf32>
    %47 = arith.mulf %46, %37 : vector<1x16xf32>
    %cst_18 = arith.constant 2.000000e+00 : f32
    %48 = vector.broadcast %cst_18 : f32 to vector<1x16xf32>
    %49 = arith.subf %48, %47 : vector<1x16xf32>
    %cst_19 = arith.constant 0.000000e+00 : f32
    %50 = vector.broadcast %cst_19 : f32 to vector<1x16xf32>
    %51 = arith.maximumf %49, %50 : vector<1x16xf32>
    %cst_20 = arith.constant dense<0.000000e+00> : vector<1xf32>
    %52 = vector.multi_reduction <add>, %51, %cst_20 [1] : vector<1x16xf32> to vector<1xf32>
    %53 = vector.shape_cast %52 : vector<1xf32> to vector<1x1xf32>
    %54 = math.sqrt %53 : vector<1x1xf32>
    %c0_21 = arith.constant 0 : index
    %c0_22 = arith.constant 0 : index
    %55 = vector.load %arg4[%c0_21, %c0_22] : memref<1x1xf32, #tpu.memory_space<vmem>>, vector<1x1xf32>
    tpu.vector_store %arg4[%c0_21, %c0_22], %54 {strides = array<i32>} : memref<1x1xf32, #tpu.memory_space<vmem>>, vector<1x1xf32>,
    return
  }
}

</mosaic_0001>

<bundles_post_ra>
// kernel: tpu_custom_call.1
= control target key start
LH: loop header
LB: loop body
LE: loop exit
PB: predicated region body
PF: predicated region fallthrough
CT: control target
= control target key end

     0   :  { %11 = vsyncpa [#allocation3], 0  ;;  %vm44_vm0 = vcmask 1043456   ;;  %s589_s13 = smov 32   ;;  %s741_s0 = inlined_call_operand.vmem [shape: f32[16,32], index: 0, kind: input, shape index: {}]   ;;  %s742_s1 = inlined_call_operand.vmem [shape: f32[64,32], index: 1, kind: input, shape index: {}]   ;;  %s743_s2 = inlined_call_operand.vmem [shape: f32[64,32], index: 2, kind: input, shape index: {}]   ;;  %s744_s3 = inlined_call_operand.vmem [shape: f32[2,32], index: 3, kind: input, shape index: {}]   ;;  %s745_s4 = inlined_call_operand.hbm [shape: f32[1,1], index: 4, kind: output, shape index: {0}]   ;;  %s746_s5 = inlined_call_operand.hbm [shape: s32[1,16], index: 5, kind: output, shape index: {1}]  }
   0x1   :  { %v27_v0 = vld [vmem:[%s742_s1 + $0x20] sm:$0xff]  ;;  %v28_v1 = vld [vmem:[%s742_s1 + $0x28] sm:$0xff]  ;;  %v29_v5 = vld [vmem:[%s742_s1 + $0x30] sm:$0xff] }
   0x2   :  { %v24_v2 = vld [vmem:[%s742_s1 + $0x8] sm:$0xff]  ;;  %v45_v3 = vrot.slane %v27_v0, 4  ;;  %v46_v4 = vrot.slane %v28_v1, 4  ;;  %v30_v6 = vld [vmem:[%s742_s1 + $0x38] sm:$0xff]  ;;  %v48_v8 = vrot.slane %v29_v5, 4  ;;  %v37_v11 = vld [vmem:[%s743_s2 + $0x30] sm:$0xff] }
   0x3   :  { %v26_v7 = vld [vmem:[%s742_s1 + $0x18] sm:$0xff]  ;;  %v50_v9 = vrot.slane %v30_v6, 4  ;;  %v25_v13 = vld [vmem:[%s742_s1 + $0x10] sm:$0xff]  ;;  %v36_v18 = vld [vmem:[%s743_s2 + $0x28] sm:$0xff] }
   0x4   :  { %v38_v10 = vld [vmem:[%s743_s2 + $0x38] sm:$0xff]  ;;  %v47_v12 = vsel %vm44_vm0, %v45_v3, %v46_v4  ;;  %v49_v17 = vsel %vm44_vm0, %v46_v4, %v48_v8  ;;  %v35_v23 = vld [vmem:[%s743_s2 + $0x20] sm:$0xff] }
   0x5   :  { %483 = vmatprep.subr.mxu0 %v38_v10  ;;  %v60_v14 = vmul.f32 %v47_v12, %v24_v2  ;;  %v56_v15 = vadd.f32 %v47_v12, %v24_v2  ;;  %v51_v16 = vsel %vm44_vm0, %v48_v8, %v50_v9  ;;  %v57_v21 = vadd.f32 %v49_v17, %v25_v13 }
   0x6   :  { %484 = vmatpush3.msra.mxu0 %v38_v10  ;;  %v62_v19 = vmul.f32 %v51_v16, %v26_v7  ;;  %v58_v20 = vadd.f32 %v51_v16, %v26_v7  ;;  %v61_v22 = vmul.f32 %v49_v17, %v25_v13  ;;  %v59_v24 = vadd.f32 %v50_v9, %v27_v0 }
   0x7   :  { %485 = vmatprep.subr.mxu0 %v37_v11  ;;  %68 = vrot.lane.b32.xlu0 %v60_v14, %s589_s13 }
   0x8   :  { %486 = vmatpush3.msra.mxu0 %v37_v11 }
   0x9   :  { %12 = vsyncpa [#allocation5], 0  ;;  %72 = vrot.lane.b32.xlu1 %v62_v19, %s589_s13  ;;  %v63_v25 = vmul.f32 %v50_v9, %v27_v0  ;;  %487 = vmatprep.subr.mxu0 %v36_v18  ;;  %v34_v26 = vld [vmem:[%s743_s2 + $0x18] sm:$0xff]  ;;  %v33_v27 = vld [vmem:[%s743_s2 + $0x10] sm:$0xff]  ;;  %vm80_vm1 = vcmask 261120   ;;  %vm94_vm2 = vcmask 523264   ;;  %v90_v47 = vlaneseq }
   0xa   :  { %488 = vmatpush3.msra.mxu0 %v36_v18  ;;  %v32_v28 = vld [vmem:[%s743_s2 + $0x8] sm:$0xff]  ;;  %v31_v29 = vld [vmem:[%s743_s2] sm:$0xff]  ;;  %vm223_vm3 = vcmask 257024   ;;  %v590_v16 = vmov 0.0   ;;  %vm591_vm4 = vmmov 0   ;;  %vm353_vm5 = vcmask 130048  }
   0xb   :  { %489 = vmatprep.subr.mxu0 %v35_v23  ;;  %70 = vrot.lane.b32.xlu0 %v61_v22, %s589_s13  ;;  %v675_v30 = vld [vmem:[%s741_s0 + $0x8] sm:$0xff]  ;;  %v682_v32 = vld [vmem:[%s741_s0] sm:$0xff]  ;;  %v699_v51 = vshrl.u32 %v90_v47, 7  ;;  %vm358_vm6 = vcmask 125952  }
   0xc   :  { %490 = vmatpush3.msra.mxu0 %v35_v23  ;;  %v193_v31 = vmul.f32 %v675_v30, %v675_v30  ;;  %v192_v34 = vmul.f32 %v682_v32, %v682_v32  ;;  %v23_v44 = vld [vmem:[%s742_s1] sm:$0xff]  ;;  %505 = vmatprep.subr.mxu1 %v590_v16  ;;  %s592_s1 = smov [#allocation4]  }
   0xd   :  { %74 = vrot.lane.b32.xlu1 %v63_v25, %s589_s13  ;;  %491 = vmatprep.subr.mxu0 %v34_v26  ;;  %v206_v45 = vmul.f32 %v23_v44, %v23_v44  ;;  %v39_v48 = vld [vmem:[%s744_s3] sm:$0x3]  ;;  %v92_v53 = vsub.s32 0, %v699_v51  ;;  %s441_s3 = sshll.u32 %s592_s1, 4  ;;  %s442_s3 = int_to_ptr.vmem [resolvable:$true] %s441_s3 }
   0xe   :  { %492 = vmatpush3.msra.mxu0 %v34_v26  ;;  %v197_v33 = vsel %vm80_vm1, %v193_v31, 0.0  ;;  %v194_v35 = vsel %vm80_vm1, %v192_v34, 0.0  ;;  %v85_v49 = vmul.f32 2.0, %v39_v48  ;;  %v87_v50 = vrot.slane %v39_v48, 1  ;;  %509 = vmatprep.mubr.msk.f32.mxu1 %vm591_vm4, %v590_v16  ;;  %s545_s30 = scalar_lea.vmem %s442_s3, 16  ;;  %s549_s6 = scalar_lea.vmem %s442_s3, 32 }
   0xf   :  { %493 = vmatprep.subr.mxu0 %v33_v27  ;;  %v211_v46 = vsel %vm80_vm1, %v206_v45, 0.0  ;;  %p546_p0 = scmp.ne.s32.totalorder %s442_s3, %s545_s30  ;;  %p550_p1 = scmp.lt.s32.totalorder %s442_s3, %s442_s3 }
  0x10   :  { %494 = vmatpush3.msra.mxu0 %v33_v27  ;;  %v89_v52 = vadd.f32 %v87_v50, %v85_v49  ;;  %p551_p2 = scmp.lt.s32.totalorder %s549_s6, %s545_s30 }
  0x11   :  { %495 = vmatprep.subr.mxu0 %v32_v28 }
  0x12   :  { %496 = vmatpush3.msra.mxu0 %v32_v28  ;;  %v93_v54 = vrot.slane %v89_v52, %v92_v53  ;;  %p552_p3 = por %p551_p2, %p550_p1 }
  0x13   :  { %497 = vmatprep.subr.mxu0 %v31_v29 }
  0x14   :  { %498 = vmatpush3.msra.mxu0 %v31_v29  ;;  %p553_p4 = pnand %p552_p3, %p546_p0 }
  0x2a   :  { %198 = vadd.xlane.f32.xlu0 %v197_v33 }
  0x2e   :  { %212 = vadd.xlane.f32.xlu0 %v211_v46 }
  0x31   :  { %195 = vadd.xlane.f32.xlu1 %v194_v35 }
  0x79   :  { %v69_v36 = vpop.permute.xlu0 %68 }
  0x7a   :  { %v81_v37 = vsel %vm80_vm1, %v56_v15, %v69_v36 }
  0x7b   :  { %v73_v38 = vpop.permute.xlu1 %72  ;;  %499 = vmatprep.mubr.msk.f32.mxu0 %vm94_vm2, %v81_v37 }
  0x7c   :  { %v83_v39 = vsel %vm80_vm1, %v58_v20, %v73_v38 }
  0x7d   :  { %v71_v40 = vpop.permute.xlu0 %70 }
  0x7e   :  { %v82_v41 = vsel %vm80_vm1, %v57_v21, %v71_v40 }
  0x7f   :  { %v75_v42 = vpop.permute.xlu1 %74  ;;  %500 = vmatmul.mubr.msk.f32.vlgmr.msra.gmra.mxu0 %vm94_vm2, %v82_v41 }
  0x80   :  { %v84_v43 = vsel %vm80_vm1, %v59_v24, %v75_v42  ;;  %502 = vmatprep.mubr.msk.f32.mxu0 %vm94_vm2, %v83_v39 }
  0x83   :  { %503 = vmatmul.mubr.msk.f32.gmra.mxu0 %vm94_vm2, %v84_v43  ;;  %vm408_vm2 = vcmask 122880  }
  0xb3   :  { %v199_v55 = vpop.xlane.xlu0 %198 }
  0xb4   :  { %v201_v58 = vmax.f32 %v199_v55, 1e-24 }
  0xb6   :  { %529 = vrsqrt.f32 %v201_v58 }
  0xb7   :  { %v213_v11 = vpop.xlane.xlu0 %212 }
  0xb8   :  { %v227_v12 = vmax.f32 %v213_v11, 1e-24 }
  0xba   :  { %v196_v59 = vpop.xlane.xlu1 %195 }
  0xbb   :  { %v200_v0 = vmax.f32 %v196_v59, 1e-24 }
  0xbd   :  { %531 = vrsqrt.f32 %v200_v0  ;;  %v374_v0 = vadd.s32 24, %v699_v51 }
  0xbe   :  { %533 = vrsqrt.f32 %v227_v12 }
  0xc3   :  { %v530_v13 = vpop.eup %529 }
  0xc4   :  { %v205_v15 = vmul.f32 %v530_v13, %v675_v30 }
  0xc6   :  { %506 = vmatpush3.xpose.msk.msra.mxu1 %vm80_vm1, %v205_v15 }
  0xc7   :  { %507 = vmatprep.subr.mxu1 %v590_v16 }
  0xca   :  { %v532_v14 = vpop.eup %531 }
  0xcb   :  { %v204_v17 = vmul.f32 %v532_v14, %v682_v32  ;;  %v534_v18 = vpop.eup %533 }
  0xcc   :  { %v237_v19 = vmul.f32 %v534_v18, %v23_v44 }
  0xcd   :  { %508 = vmatpush3.xpose.msk.msra.mxu1 %vm80_vm1, %v204_v17 }
  0xd0   :  { %510 = vmatmul.mubr.msk.f32.vlgmr.msra.gmra.mxu1 %vm80_vm1, %v237_v19 }
  0xd1   :  { %512 = vmatprep.mubr.msk.f32.mxu1 %vm591_vm4, %v590_v16 }
 0x13f   :  { %v501_v56 = vpop.f32.mrf.mxu0 }
 0x140   :  { %v179_v57 = vadd.f32 %v501_v56, %v93_v54 }
 0x141   :  { %v173_v60 = vpop.f32.mrf.mxu0 }
 0x142   :  { %v174_v61 = vadd.f32 %v173_v60, %v93_v54  ;;  %v208_v62 = vmul.f32 %v179_v57, %v179_v57 }
 0x143   :  { %v504_v63 = vpop.f32.mrf.mxu0 }
 0x144   :  { %v189_v1 = vadd.f32 %v504_v63, %v93_v54  ;;  %v217_v2 = vsel %vm80_vm1, %v208_v62, 0.0  ;;  %v207_v3 = vmul.f32 %v174_v61, %v174_v61  ;;  %v372_v63 = vadd.s32 8, %v699_v51 }
 0x145   :  { %v183_v4 = vpop.f32.mrf.mxu0  ;;  %218 = vadd.xlane.f32.xlu1 %v217_v2 }
 0x146   :  { %v184_v5 = vadd.f32 %v183_v4, %v93_v54  ;;  %v214_v6 = vsel %vm80_vm1, %v207_v3, 0.0  ;;  %v210_v7 = vmul.f32 %v189_v1, %v189_v1 }
 0x147   :  { %215 = vadd.xlane.f32.xlu0 %v214_v6 }
 0x148   :  { %v224_v8 = vsel %vm223_vm3, %v210_v7, 0.0  ;;  %v209_v9 = vmul.f32 %v184_v5, %v184_v5 }
 0x149   :  { %225 = vadd.xlane.f32.xlu1 %v224_v8 }
 0x14a   :  { %v220_v10 = vsel %vm80_vm1, %v209_v9, 0.0 }
 0x14b   :  { %221 = vadd.xlane.f32.xlu0 %v220_v10 }
 0x190   :  { %v329_v36 = vpop.f32.mrf.mxu1 }
 0x191   :  { %v354_v45 = vsel %vm353_vm5, %v329_v36, -inf }
 0x192   :  { %v511_v37 = vpop.f32.mrf.mxu1 }
 0x1ce   :  { %v219_v20 = vpop.xlane.xlu1 %218 }
 0x1cf   :  { %v229_v22 = vmax.f32 %v219_v20, 1e-24 }
 0x1d0   :  { %v216_v21 = vpop.xlane.xlu0 %215 }
 0x1d1   :  { %v228_v23 = vmax.f32 %v216_v21, 1e-24 }
 0x1d2   :  { %v226_v26 = vpop.xlane.xlu1 %225 }
 0x1d3   :  { %535 = vrsqrt.f32 %v228_v23  ;;  %v231_v27 = vmax.f32 %v226_v26, 1e-24 }
 0x1d4   :  { %v222_v24 = vpop.xlane.xlu0 %221  ;;  %537 = vrsqrt.f32 %v229_v22 }
 0x1d5   :  { %v230_v25 = vmax.f32 %v222_v24, 1e-24 }
 0x1d7   :  { %539 = vrsqrt.f32 %v230_v25 }
 0x1d8   :  { %541 = vrsqrt.f32 %v231_v27 }
 0x1e0   :  { %v536_v28 = vpop.eup %535 }
 0x1e1   :  { %v238_v29 = vmul.f32 %v536_v28, %v174_v61  ;;  %v538_v30 = vpop.eup %537  ;;  %v373_v61 = vadd.s32 16, %v699_v51 }
 0x1e2   :  { %v239_v31 = vmul.f32 %v538_v30, %v179_v57 }
 0x1e3   :  { %513 = vmatmul.mubr.msk.f32.gmra.mxu1 %vm80_vm1, %v238_v29 }
 0x1e4   :  { %515 = vmatprep.mubr.msk.f32.mxu1 %vm591_vm4, %v590_v16  ;;  %v540_v32 = vpop.eup %539 }
 0x1e5   :  { %v240_v33 = vmul.f32 %v540_v32, %v184_v5  ;;  %v542_v34 = vpop.eup %541 }
 0x1e6   :  { %v241_v35 = vmul.f32 %v542_v34, %v189_v1  ;;  %v375_v1 = vadd.s32 32, %v699_v51 }
 0x1e7   :  { %516 = vmatmul.mubr.msk.f32.gmra.mxu1 %vm80_vm1, %v239_v31 }
 0x1e8   :  { %518 = vmatprep.mubr.msk.f32.mxu1 %vm591_vm4, %v590_v16 }
 0x1eb   :  { %519 = vmatmul.mubr.msk.f32.gmra.mxu1 %vm80_vm1, %v240_v33 }
 0x1ec   :  { %521 = vmatprep.mubr.msk.f32.mxu1 %vm591_vm4, %v590_v16 }
 0x1ef   :  { %522 = vmatmul.mubr.msk.f32.gmra.mxu1 %vm80_vm1, %v241_v35 }
 0x2a3   :  { %v334_v38 = vpop.f32.mrf.mxu1 }
 0x2a4   :  { %v355_v50 = vsel %vm353_vm5, %v334_v38, -inf }
 0x2a5   :  { %v514_v39 = vpop.f32.mrf.mxu1 }
 0x2a7   :  { %v339_v40 = vpop.f32.mrf.mxu1 }
 0x2a8   :  { %v356_v52 = vsel %vm353_vm5, %v339_v40, -inf }
 0x2a9   :  { %v517_v41 = vpop.f32.mrf.mxu1 }
 0x2ab   :  { %v344_v42 = vpop.f32.mrf.mxu1 }
 0x2ac   :  { %v357_v46 = vsel %vm353_vm5, %v344_v42, -inf }
 0x2ad   :  { %v520_v43 = vpop.f32.mrf.mxu1  ;;  %v362_v53 = vmax.f32 %v356_v52, %v357_v46 }
 0x2af   :  { %v349_v44 = vpop.f32.mrf.mxu1 }
 0x2b0   :  { %v359_v47 = vsel %vm358_vm6, %v349_v44, -inf }
 0x2b1   :  { %v360_v48 = vmax.f32 %v354_v45, %v359_v47  ;;  %v523_v49 = vpop.f32.mrf.mxu1 }
 0x2b3   :  { %v361_v54 = vmax.f32 %v360_v48, %v355_v50 }
 0x2b5   :  { %v363_v55 = vmax.f32 %v361_v54, %v362_v53 }
 0x2b7   :  { %v364_v56 = vrot.slane %v363_v55, 4 }
 0x2b9   :  { %v365_v57 = vmax.f32 %v363_v55, %v364_v56 }
 0x2bb   :  { %v366_v58 = vrot.slane %v365_v57, 2 }
 0x2bd   :  { %v367_v59 = vmax.f32 %v365_v57, %v366_v58 }
 0x2bf   :  { %v368_v60 = vrot.slane %v367_v59, 1 }
 0x2c1   :  { %v369_v62 = vmax.f32 %v367_v59, %v368_v60 }
 0x2c3   :  { %vm376_vm7 = vcmp.ge.f32.partialorder %v329_v36, %v369_v62  ;;  %vm377_vm8 = vcmp.ge.f32.partialorder %v334_v38, %v369_v62  ;;  %vm378_vm9 = vcmp.ge.f32.partialorder %v339_v40, %v369_v62  ;;  %vm379_vm10 = vcmp.ge.f32.partialorder %v344_v42, %v369_v62 }
 0x2c4   :  { %vm380_vm11 = vcmp.ge.f32.partialorder %v349_v44, %v369_v62  ;;  %v381_v2 = vsel %vm376_vm7, %v699_v51, 36  ;;  %v383_v3 = vsel %vm378_vm9, %v373_v61, 36  ;;  %v382_v4 = vsel %vm377_vm8, %v372_v63, 36 }
 0x2c5   :  { %v384_v5 = vsel %vm379_vm10, %v374_v0, 36  ;;  %v385_v6 = vsel %vm380_vm11, %v375_v1, 36  ;;  %v386_v7 = vsel %vm353_vm5, %v381_v2, 2147483647  ;;  %v388_v8 = vsel %vm353_vm5, %v383_v3, 2147483647 }
 0x2c6   :  { %v389_v9 = vsel %vm353_vm5, %v384_v5, 2147483647  ;;  %v390_v10 = vsel %vm358_vm6, %v385_v6, 2147483647  ;;  %v410_v11 = vmul.f32 2.0, %v369_v62 }
 0x2c7   :  { %vm391_vm12 = vcmp.lt.s32.totalorder %v386_v7, %v390_v10  ;;  %vm395_vm13 = vcmp.lt.s32.totalorder %v388_v8, %v389_v9  ;;  %v387_v12 = vsel %vm353_vm5, %v382_v4, 2147483647 }
 0x2c8   :  { %v392_v13 = vsel %vm391_vm12, %v386_v7, %v390_v10  ;;  %v411_v51 = vsub.f32 2.0, %v410_v11  ;;  %v396_v15 = vsel %vm395_vm13, %v388_v8, %v389_v9 }
 0x2c9   :  { %vm393_vm14 = vcmp.lt.s32.totalorder %v392_v13, %v387_v12 }
 0x2ca   :  { %v394_v14 = vsel %vm393_vm14, %v392_v13, %v387_v12  ;;  %v412_v16 = vmax.f32 %v411_v51, 0.0 }
 0x2cb   :  { %vm397_vm15 = vcmp.lt.s32.totalorder %v394_v14, %v396_v15 }
 0x2cc   :  { %v398_v17 = vsel %vm397_vm15, %v394_v14, %v396_v15  ;;  %v413_v18 = vsel %vm353_vm5, %v412_v16, 0.0 }
 0x2cd   :  { %v399_v19 = vrot.slane %v398_v17, 4  ;;  %414 = vadd.xlane.f32.xlu0 %v413_v18 }
 0x2cf   :  { %vm400_vm0 = vcmp.lt.s32.totalorder %v398_v17, %v399_v19 }
 0x2d0   :  { %v401_v20 = vsel %vm400_vm0, %v398_v17, %v399_v19 }
 0x2d1   :  { %v402_v21 = vrot.slane %v401_v20, 2 }
 0x2d3   :  { %vm403_vm1 = vcmp.lt.s32.totalorder %v401_v20, %v402_v21 }
 0x2d4   :  { %v404_v22 = vsel %vm403_vm1, %v401_v20, %v402_v21 }
 0x2d5   :  { %v405_v23 = vrot.slane %v404_v22, 1 }
 0x2d7   :  { %vm406_vm3 = vcmp.lt.s32.totalorder %v404_v22, %v405_v23 }
 0x2d8   :  { %v407_v24 = vsel %vm406_vm3, %v404_v22, %v405_v23 }
 0x2d9   :  { %409 = vst.msk [vmem:[#allocation4] sm:$0x1] %vm408_vm2, %v407_v24 }
 0x2da   :  { %556 = shalt.err (!%p553_p4)
}
 0x2db   :  { %444 = dma.vmem_to_hbm [thread:$0]  %s442_s3, 16, %s746_s5, [#allocation5]   ;;  %vm423_vm5 = vcmask 0  }
 0x2dc   :  { %s593_s9 = smov [#allocation2]  }
 0x2dd   :  { %s431_s10 = sshll.u32 %s593_s9, 4  ;;  %s432_s10 = int_to_ptr.vmem [resolvable:$true] %s431_s10 }
 0x2de   :  { %s565_s11 = scalar_lea.vmem %s432_s10, 16  ;;  %s569_s12 = scalar_lea.vmem %s432_s10, 32 }
 0x2df   :  { %p566_p5 = scmp.ne.s32.totalorder %s432_s10, %s565_s11  ;;  %p570_p6 = scmp.lt.s32.totalorder %s432_s10, %s432_s10 }
 0x2e0   :  { %p571_p7 = scmp.lt.s32.totalorder %s569_s12, %s565_s11 }
 0x2e2   :  { %p572_p8 = por %p571_p7, %p570_p6 }
 0x2e4   :  { %p573_p9 = pnand %p572_p8, %p566_p5 }
 0x356   :  { %v415_v25 = vpop.xlane.xlu0 %414 }
 0x357   :  { %543 = vrsqrt.f32 %v415_v25  ;;  %vm418_vm4 = vcmp.eq.f32.partialorder %v415_v25, inf  ;;  %v421_v28 = vand.u32 2147483648, %v415_v25  ;;  %vm420_vm6 = vcmp.eq.f32.partialorder %v415_v25, 0.0 }
 0x364   :  { %v544_v26 = vpop.eup %543 }
 0x365   :  { %v417_v27 = vmul.f32 %v544_v26, %v415_v25 }
 0x367   :  { %v419_v29 = vsel %vm418_vm4, %v415_v25, %v417_v27 }
 0x368   :  { %v422_v30 = vsel %vm420_vm6, %v421_v28, %v419_v29 }
 0x369   :  { %424 = vst.msk [vmem:[#allocation2] sm:$0x1] %vm423_vm5, %v422_v30 }
 0x36a   :  { %576 = shalt.err (!%p573_p9)
}
 0x36b   :  { %434 = dma.vmem_to_hbm [thread:$0]  %s432_s10, 16, %s745_s4, [#allocation3]  }
 0x36c   :  { %585 = dma.done.wait [#allocation3], 16  }
 0x36d   :  { %586 = vsyncadd [#allocation3], 4294967280 }
 0x36e   :  { %587 = dma.done.wait [#allocation5], 16  }
 0x36f   :  { %588 = vsyncadd [#allocation5], 4294967280 }
 0x370   :  { %451 = vsyncpa [#allocation3], 1 }
 0x371   :  { %452 = vsyncpa [#allocation5], 1 }

</bundles_post_ra>
